<compile_context>
chip_gen: v7x
topology: tpu7x:2x2x1
jax: 0.10.0
libtpu: 0.0.40
codegen_flags: <defaults>
</compile_context>

<pallas_src>
import jax
import jax.numpy as jnp
from jax.experimental import pallas as pl
from jax.experimental.pallas import tpu as pltpu


def _round_up(x, m):
    return ((x + m - 1) // m) * m


def weighted_sum_fusion_kernel(
    x_ref, y_ref,
    w_att_x_ref, b_att_x_ref,
    w_att_y_ref, b_att_y_ref,
    w_fc_x_ref, b_fc_x_ref,
    w_fc_y_ref, b_fc_y_ref,
    out_x_ref, out_y_ref, out_ref,
):
    x = x_ref[...]
    y = y_ref[...]
    in_dtype = x.dtype

    # weight_x = sigmoid(att_x(x)); weight_y = sigmoid(att_y(y))
    gate_x = jax.nn.sigmoid(
        jnp.dot(x, w_att_x_ref[...], preferred_element_type=jnp.float32)
        + b_att_x_ref[...]
    )
    gate_y = jax.nn.sigmoid(
        jnp.dot(y, w_att_y_ref[...], preferred_element_type=jnp.float32)
        + b_att_y_ref[...]
    )

    # Keep MXU inputs in the native activation dtype (matters for bf16),
    # accumulate in f32.
    gated_x = (gate_x * x).astype(in_dtype)
    gated_y = (gate_y * y).astype(in_dtype)

    out_x = (
        jnp.dot(gated_x, w_fc_x_ref[...], preferred_element_type=jnp.float32)
        + b_fc_x_ref[...]
    )
    out_y = (
        jnp.dot(gated_y, w_fc_y_ref[...], preferred_element_type=jnp.float32)
        + b_fc_y_ref[...]
    )

    out_x_ref[...] = out_x.astype(out_x_ref.dtype)
    out_y_ref[...] = out_y.astype(out_y_ref.dtype)
    out_ref[...] = (out_x + out_y).astype(out_ref.dtype)


def weighted_sum_fusion(x, y, params, *, tile_b=256,
                        vmem_limit_bytes=32 * 1024 * 1024):
    """params: dict with w_att_x, b_att_x, w_att_y, b_att_y, w_fc_x, b_fc_x,
    w_fc_y, b_fc_y.  Weights are (D_in, D_out) (transposed vs. PyTorch so the
    kernel computes x @ W + b); biases are (1, D_out)."""
    B, D = x.shape
    out_dim = params["w_fc_x"].shape[1]
    dtype = x.dtype

    # Lane-dense padding: feature/output dims -> multiples of 128,
    # batch -> multiple of the (8-sublane-aligned) batch tile.
    d_pad = _round_up(D, 128)
    o_pad = _round_up(out_dim, 128)
    tb = min(_round_up(tile_b, 8), _round_up(B, 8))
    b_pad = _round_up(B, tb)
    grid = (b_pad // tb,)

    def pad2(a, rows, cols):
        return jnp.pad(a, ((0, rows - a.shape[0]), (0, cols - a.shape[1])))

    xp = pad2(x, b_pad, d_pad)
    yp = pad2(y, b_pad, d_pad)
    w_att_x = pad2(params["w_att_x"], d_pad, d_pad)
    b_att_x = pad2(params["b_att_x"], 1, d_pad)
    w_att_y = pad2(params["w_att_y"], d_pad, d_pad)
    b_att_y = pad2(params["b_att_y"], 1, d_pad)
    w_fc_x = pad2(params["w_fc_x"], d_pad, o_pad)
    b_fc_x = pad2(params["b_fc_x"], 1, o_pad)
    w_fc_y = pad2(params["w_fc_y"], d_pad, o_pad)
    b_fc_y = pad2(params["b_fc_y"], 1, o_pad)

    # Batch-tiled activation / output specs (auto double-buffered pipeline).
    act_spec = pl.BlockSpec((tb, d_pad), lambda i: (i, 0))
    out_spec = pl.BlockSpec((tb, o_pad), lambda i: (i, 0))

    # Weights/biases: constant index_map -> DMA'd once, VMEM-resident.
    def const_spec(shape):
        return pl.BlockSpec(shape, lambda i: (0, 0))

    itemsize = jnp.dtype(dtype).itemsize
    flops = 4 * b_pad * d_pad * d_pad + 4 * b_pad * d_pad * o_pad
    bytes_accessed = itemsize * (
        2 * b_pad * d_pad                        # x, y
        + 2 * d_pad * d_pad + 2 * d_pad * o_pad  # weights
        + 2 * d_pad + 2 * o_pad                  # biases
        + 3 * b_pad * o_pad                      # three outputs
    )

    out_shapes = tuple(
        jax.ShapeDtypeStruct((b_pad, o_pad), dtype) for _ in range(3)
    )

    fn = pl.pallas_call(
        weighted_sum_fusion_kernel,
        out_shape=out_shapes,
        grid=grid,
        in_specs=[
            act_spec, act_spec,
            const_spec((d_pad, d_pad)), const_spec((1, d_pad)),
            const_spec((d_pad, d_pad)), const_spec((1, d_pad)),
            const_spec((d_pad, o_pad)), const_spec((1, o_pad)),
            const_spec((d_pad, o_pad)), const_spec((1, o_pad)),
        ],
        out_specs=(out_spec, out_spec, out_spec),
        compiler_params=pltpu.CompilerParams(
            dimension_semantics=("parallel",),
            vmem_limit_bytes=vmem_limit_bytes,
        ),
        cost_estimate=pl.CostEstimate(
            flops=flops,
            transcendentals=2 * b_pad * d_pad,   # two sigmoids
            bytes_accessed=bytes_accessed,
        ),
    )

    out_x_p, out_y_p, out_p = fn(
        xp, yp,
        w_att_x, b_att_x,
        w_att_y, b_att_y,
        w_fc_x, b_fc_x,
        w_fc_y, b_fc_y,
    )
    return (
        out_x_p[:B, :out_dim],
        out_y_p[:B, :out_dim],
        out_p[:B, :out_dim],
    )


def init_params(key, input_dim, output_dim, dtype=jnp.float32):
    keys = jax.random.split(key, 8)

    def lin(kw, kb, din, dout):
        # deterministic uniform init (same spirit as nn.Linear default)
        bound = 1.0 / (din ** 0.5)
        w = jax.random.uniform(kw, (din, dout), dtype, -bound, bound)
        b = jax.random.uniform(kb, (1, dout), dtype, -bound, bound)
        return w, b

    w_att_x, b_att_x = lin(keys[0], keys[1], input_dim, input_dim)
    w_att_y, b_att_y = lin(keys[2], keys[3], input_dim, input_dim)
    w_fc_x, b_fc_x = lin(keys[4], keys[5], input_dim, output_dim)
    w_fc_y, b_fc_y = lin(keys[6], keys[7], input_dim, output_dim)
    return dict(
        w_att_x=w_att_x, b_att_x=b_att_x,
        w_att_y=w_att_y, b_att_y=b_att_y,
        w_fc_x=w_fc_x, b_fc_x=b_fc_x,
        w_fc_y=w_fc_y, b_fc_y=b_fc_y,
    )


def reference(x, y, p):
    gx = jax.nn.sigmoid(x @ p["w_att_x"] + p["b_att_x"])
    gy = jax.nn.sigmoid(y @ p["w_att_y"] + p["b_att_y"])
    ox = (gx * x) @ p["w_fc_x"] + p["b_fc_x"]
    oy = (gy * y) @ p["w_fc_y"] + p["b_fc_y"]
    return ox, oy, ox + oy


if __name__ == "__main__":
    batch = 8
    input_dim = 32
    output_dim = 16

    key = jax.random.PRNGKey(0)
    kx, ky, kp = jax.random.split(key, 3)
    x = jax.random.normal(kx, (batch, input_dim), jnp.float32)
    y = jax.random.normal(ky, (batch, input_dim), jnp.float32)
    params = init_params(kp, input_dim, output_dim)

    out_x, out_y, out = weighted_sum_fusion(x, y, params)
    jax.block_until_ready((out_x, out_y, out))

    # sanity-check against a pure-JAX reference
    rx, ry, r = reference(x, y, params)
    assert jnp.allclose(out_x, rx, atol=1e-5, rtol=1e-5)
    assert jnp.allclose(out_y, ry, atol=1e-5, rtol=1e-5)
    assert jnp.allclose(out, r, atol=1e-5, rtol=1e-5)

    print("KERNEL_OK")
</pallas_src>

<mosaic_0001>
module attributes {stable_mosaic.version = 11 : i64} {
  func.func @weighted_sum_fusion_kernel(%arg0: i32, %arg1: memref<8x128xf32, #tpu.memory_space<vmem>>, %arg2: memref<8x128xf32, #tpu.memory_space<vmem>>, %arg3: memref<128x128xf32, #tpu.memory_space<vmem>>, %arg4: memref<1x128xf32, #tpu.memory_space<vmem>>, %arg5: memref<128x128xf32, #tpu.memory_space<vmem>>, %arg6: memref<1x128xf32, #tpu.memory_space<vmem>>, %arg7: memref<128x128xf32, #tpu.memory_space<vmem>>, %arg8: memref<1x128xf32, #tpu.memory_space<vmem>>, %arg9: memref<128x128xf32, #tpu.memory_space<vmem>>, %arg10: memref<1x128xf32, #tpu.memory_space<vmem>>, %arg11: memref<8x128xf32, #tpu.memory_space<vmem>>, %arg12: memref<8x128xf32, #tpu.memory_space<vmem>>, %arg13: memref<8x128xf32, #tpu.memory_space<vmem>>) attributes {dimension_semantics = [#tpu.dimension_semantics<parallel>], iteration_bounds = array<i64: 1>, scalar_prefetch = 0 : i64, scratch_operands = 0 : i64, tpu.core_type = #tpu.core_type<tc>, window_params = [{transform_indices = @transform_0, window_bounds = array<i64: 8, 128>}, {transform_indices = @transform_1, window_bounds = array<i64: 8, 128>}, {pipeline_mode = #tpu.pipeline_mode<synchronous>, transform_indices = @transform_2, window_bounds = array<i64: 128, 128>}, {pipeline_mode = #tpu.pipeline_mode<synchronous>, transform_indices = @transform_3, window_bounds = array<i64: 1, 128>}, {pipeline_mode = #tpu.pipeline_mode<synchronous>, transform_indices = @transform_4, window_bounds = array<i64: 128, 128>}, {pipeline_mode = #tpu.pipeline_mode<synchronous>, transform_indices = @transform_5, window_bounds = array<i64: 1, 128>}, {pipeline_mode = #tpu.pipeline_mode<synchronous>, transform_indices = @transform_6, window_bounds = array<i64: 128, 128>}, {pipeline_mode = #tpu.pipeline_mode<synchronous>, transform_indices = @transform_7, window_bounds = array<i64: 1, 128>}, {pipeline_mode = #tpu.pipeline_mode<synchronous>, transform_indices = @transform_8, window_bounds = array<i64: 128, 128>}, {pipeline_mode = #tpu.pipeline_mode<synchronous>, transform_indices = @transform_9, window_bounds = array<i64: 1, 128>}, {transform_indices = @transform_10, window_bounds = array<i64: 8, 128>}, {transform_indices = @transform_11, window_bounds = array<i64: 8, 128>}, {transform_indices = @transform_12, window_bounds = array<i64: 8, 128>}]} {
    %c0 = arith.constant 0 : index
    %c0_0 = arith.constant 0 : index
    %0 = vector.load %arg1[%c0, %c0_0] : memref<8x128xf32, #tpu.memory_space<vmem>>, vector<8x128xf32>
    %c0_1 = arith.constant 0 : index
    %c0_2 = arith.constant 0 : index
    %1 = vector.load %arg2[%c0_1, %c0_2] : memref<8x128xf32, #tpu.memory_space<vmem>>, vector<8x128xf32>
    %c0_3 = arith.constant 0 : index
    %c0_4 = arith.constant 0 : index
    %2 = vector.load %arg3[%c0_3, %c0_4] : memref<128x128xf32, #tpu.memory_space<vmem>>, vector<128x128xf32>
    %cst = arith.constant dense<0.000000e+00> : vector<8x128xf32>
    %3 = tpu.matmul %0, %2, %cst {dimension_numbers = #tpu.dot_dimension_numbers<[1], [0], [0], [1], [0, 0, 1, 1], [], []>} : vector<8x128xf32>, vector<128x128xf32>, vector<8x128xf32> -> vector<8x128xf32>
    %c0_5 = arith.constant 0 : index
    %c0_6 = arith.constant 0 : index
    %4 = vector.load %arg4[%c0_5, %c0_6] : memref<1x128xf32, #tpu.memory_space<vmem>>, vector<1x128xf32>
    %5 = vector.broadcast %4 : vector<1x128xf32> to vector<8x128xf32>
    %6 = arith.addf %3, %5 : vector<8x128xf32>
    %7 = arith.negf %6 : vector<8x128xf32>
    %8 = math.exp %7 : vector<8x128xf32>
    %cst_7 = arith.constant 1.000000e+00 : f32
    %9 = vector.broadcast %cst_7 : f32 to vector<8x128xf32>
    %10 = arith.addf %9, %8 : vector<8x128xf32>
    %11 = arith.divf %9, %10 : vector<8x128xf32>
    %c0_8 = arith.constant 0 : index
    %c0_9 = arith.constant 0 : index
    %12 = vector.load %arg5[%c0_8, %c0_9] : memref<128x128xf32, #tpu.memory_space<vmem>>, vector<128x128xf32>
    %cst_10 = arith.constant dense<0.000000e+00> : vector<8x128xf32>
    %13 = tpu.matmul %1, %12, %cst_10 {dimension_numbers = #tpu.dot_dimension_numbers<[1], [0], [0], [1], [0, 0, 1, 1], [], []>} : vector<8x128xf32>, vector<128x128xf32>, vector<8x128xf32> -> vector<8x128xf32>
    %c0_11 = arith.constant 0 : index
    %c0_12 = arith.constant 0 : index
    %14 = vector.load %arg6[%c0_11, %c0_12] : memref<1x128xf32, #tpu.memory_space<vmem>>, vector<1x128xf32>
    %15 = vector.broadcast %14 : vector<1x128xf32> to vector<8x128xf32>
    %16 = arith.addf %13, %15 : vector<8x128xf32>
    %17 = arith.negf %16 : vector<8x128xf32>
    %18 = math.exp %17 : vector<8x128xf32>
    %cst_13 = arith.constant 1.000000e+00 : f32
    %19 = vector.broadcast %cst_13 : f32 to vector<8x128xf32>
    %20 = arith.addf %19, %18 : vector<8x128xf32>
    %21 = arith.divf %19, %20 : vector<8x128xf32>
    %22 = arith.mulf %11, %0 : vector<8x128xf32>
    %23 = arith.mulf %21, %1 : vector<8x128xf32>
    %c0_14 = arith.constant 0 : index
    %c0_15 = arith.constant 0 : index
    %24 = vector.load %arg7[%c0_14, %c0_15] : memref<128x128xf32, #tpu.memory_space<vmem>>, vector<128x128xf32>
    %cst_16 = arith.constant dense<0.000000e+00> : vector<8x128xf32>
    %25 = tpu.matmul %22, %24, %cst_16 {dimension_numbers = #tpu.dot_dimension_numbers<[1], [0], [0], [1], [0, 0, 1, 1], [], []>} : vector<8x128xf32>, vector<128x128xf32>, vector<8x128xf32> -> vector<8x128xf32>
    %c0_17 = arith.constant 0 : index
    %c0_18 = arith.constant 0 : index
    %26 = vector.load %arg8[%c0_17, %c0_18] : memref<1x128xf32, #tpu.memory_space<vmem>>, vector<1x128xf32>
    %27 = vector.broadcast %26 : vector<1x128xf32> to vector<8x128xf32>
    %28 = arith.addf %25, %27 : vector<8x128xf32>
    %c0_19 = arith.constant 0 : index
    %c0_20 = arith.constant 0 : index
    %29 = vector.load %arg9[%c0_19, %c0_20] : memref<128x128xf32, #tpu.memory_space<vmem>>, vector<128x128xf32>
    %cst_21 = arith.constant dense<0.000000e+00> : vector<8x128xf32>
    %30 = tpu.matmul %23, %29, %cst_21 {dimension_numbers = #tpu.dot_dimension_numbers<[1], [0], [0], [1], [0, 0, 1, 1], [], []>} : vector<8x128xf32>, vector<128x128xf32>, vector<8x128xf32> -> vector<8x128xf32>
    %c0_22 = arith.constant 0 : index
    %c0_23 = arith.constant 0 : index
    %31 = vector.load %arg10[%c0_22, %c0_23] : memref<1x128xf32, #tpu.memory_space<vmem>>, vector<1x128xf32>
    %32 = vector.broadcast %31 : vector<1x128xf32> to vector<8x128xf32>
    %33 = arith.addf %30, %32 : vector<8x128xf32>
    %c0_24 = arith.constant 0 : index
    %c0_25 = arith.constant 0 : index
    %34 = vector.load %arg11[%c0_24, %c0_25] : memref<8x128xf32, #tpu.memory_space<vmem>>, vector<8x128xf32>
    tpu.vector_store %arg11[%c0_24, %c0_25], %28 {strides = array<i32>} : memref<8x128xf32, #tpu.memory_space<vmem>>, vector<8x128xf32>,
    %c0_26 = arith.constant 0 : index
    %c0_27 = arith.constant 0 : index
    %35 = vector.load %arg12[%c0_26, %c0_27] : memref<8x128xf32, #tpu.memory_space<vmem>>, vector<8x128xf32>
    tpu.vector_store %arg12[%c0_26, %c0_27], %33 {strides = array<i32>} : memref<8x128xf32, #tpu.memory_space<vmem>>, vector<8x128xf32>,
    %36 = arith.addf %28, %33 : vector<8x128xf32>
    %c0_28 = arith.constant 0 : index
    %c0_29 = arith.constant 0 : index
    %37 = vector.load %arg13[%c0_28, %c0_29] : memref<8x128xf32, #tpu.memory_space<vmem>>, vector<8x128xf32>
    tpu.vector_store %arg13[%c0_28, %c0_29], %36 {strides = array<i32>} : memref<8x128xf32, #tpu.memory_space<vmem>>, vector<8x128xf32>,
    return
  }
  func.func @transform_0(%arg0: i32) -> (i32, i32) {
    %c0_i32 = arith.constant 0 : i32
    %c0_i32_0 = arith.constant 0 : i32
    return %arg0, %c0_i32 : i32, i32
  }
  func.func @transform_1(%arg0: i32) -> (i32, i32) {
    %c0_i32 = arith.constant 0 : i32
    %c0_i32_0 = arith.constant 0 : i32
    return %arg0, %c0_i32 : i32, i32
  }
  func.func @transform_2(%arg0: i32) -> (i32, i32) {
    %c0_i32 = arith.constant 0 : i32
    %c0_i32_0 = arith.constant 0 : i32
    %c0_i32_1 = arith.constant 0 : i32
    return %c0_i32, %c0_i32_0 : i32, i32
  }
  func.func @transform_3(%arg0: i32) -> (i32, i32) {
    %c0_i32 = arith.constant 0 : i32
    %c0_i32_0 = arith.constant 0 : i32
    %c0_i32_1 = arith.constant 0 : i32
    return %c0_i32, %c0_i32_0 : i32, i32
  }
  func.func @transform_4(%arg0: i32) -> (i32, i32) {
    %c0_i32 = arith.constant 0 : i32
    %c0_i32_0 = arith.constant 0 : i32
    %c0_i32_1 = arith.constant 0 : i32
    return %c0_i32, %c0_i32_0 : i32, i32
  }
  func.func @transform_5(%arg0: i32) -> (i32, i32) {
    %c0_i32 = arith.constant 0 : i32
    %c0_i32_0 = arith.constant 0 : i32
    %c0_i32_1 = arith.constant 0 : i32
    return %c0_i32, %c0_i32_0 : i32, i32
  }
  func.func @transform_6(%arg0: i32) -> (i32, i32) {
    %c0_i32 = arith.constant 0 : i32
    %c0_i32_0 = arith.constant 0 : i32
    %c0_i32_1 = arith.constant 0 : i32
    return %c0_i32, %c0_i32_0 : i32, i32
  }
  func.func @transform_7(%arg0: i32) -> (i32, i32) {
    %c0_i32 = arith.constant 0 : i32
    %c0_i32_0 = arith.constant 0 : i32
    %c0_i32_1 = arith.constant 0 : i32
    return %c0_i32, %c0_i32_0 : i32, i32
  }
  func.func @transform_8(%arg0: i32) -> (i32, i32) {
    %c0_i32 = arith.constant 0 : i32
    %c0_i32_0 = arith.constant 0 : i32
    %c0_i32_1 = arith.constant 0 : i32
    return %c0_i32, %c0_i32_0 : i32, i32
  }
  func.func @transform_9(%arg0: i32) -> (i32, i32) {
    %c0_i32 = arith.constant 0 : i32
    %c0_i32_0 = arith.constant 0 : i32
    %c0_i32_1 = arith.constant 0 : i32
    return %c0_i32, %c0_i32_0 : i32, i32
  }
  func.func @transform_10(%arg0: i32) -> (i32, i32) {
    %c0_i32 = arith.constant 0 : i32
    %c0_i32_0 = arith.constant 0 : i32
    return %arg0, %c0_i32 : i32, i32
  }
  func.func @transform_11(%arg0: i32) -> (i32, i32) {
    %c0_i32 = arith.constant 0 : i32
    %c0_i32_0 = arith.constant 0 : i32
    return %arg0, %c0_i32 : i32, i32
  }
  func.func @transform_12(%arg0: i32) -> (i32, i32) {
    %c0_i32 = arith.constant 0 : i32
    %c0_i32_0 = arith.constant 0 : i32
    return %arg0, %c0_i32 : i32, i32
  }
}

</mosaic_0001>

<bundles_post_ra>
// kernel: tpu_custom_call.1
= control target key start
LH: loop header
LB: loop body
LE: loop exit
PB: predicated region body
PF: predicated region fallthrough
CT: control target
= control target key end

     0   :  { %18 = vsyncpa [#allocation3], 0  ;;  %s1370_s0 = inlined_call_operand.hbm [shape: f32[8,128], index: 0, kind: input, shape index: {}]   ;;  %s1371_s1 = inlined_call_operand.hbm [shape: f32[8,128], index: 1, kind: input, shape index: {}]   ;;  %s1372_s2 = inlined_call_operand.hbm [shape: f32[128,128], index: 2, kind: input, shape index: {}]   ;;  %s1373_s3 = inlined_call_operand.vmem [shape: f32[1,128], index: 3, kind: input, shape index: {}]   ;;  %s1374_s4 = inlined_call_operand.hbm [shape: f32[128,128], index: 4, kind: input, shape index: {}]   ;;  %s1375_s5 = inlined_call_operand.vmem [shape: f32[1,128], index: 5, kind: input, shape index: {}]   ;;  %s1376_s6 = inlined_call_operand.hbm [shape: f32[128,128], index: 6, kind: input, shape index: {}]   ;;  %s1377_s7 = inlined_call_operand.vmem [shape: f32[1,128], index: 7, kind: input, shape index: {}]   ;;  %s1378_s8 = inlined_call_operand.hbm [shape: f32[128,128], index: 8, kind: input, shape index: {}]   ;;  %s1379_s9 = inlined_call_operand.vmem [shape: f32[1,128], index: 9, kind: input, shape index: {}]   ;;  %s1380_s10 = inlined_call_operand.hbm [shape: f32[8,128], index: 10, kind: output, shape index: {0}]   ;;  %s1381_s11 = inlined_call_operand.hbm [shape: f32[8,128], index: 11, kind: output, shape index: {1}]   ;;  %s1382_s12 = inlined_call_operand.hbm [shape: f32[8,128], index: 12, kind: output, shape index: {2}]  }
   0x1   :  { %19 = vsyncpa [#allocation6], 0 }
   0x2   :  { %20 = vsyncpa [#allocation9], 0 }
   0x3   :  { %21 = vsyncpa [#allocation12], 0 }
   0x4   :  { %22 = vsyncpa [#allocation4], 0 }
   0x5   :  { %23 = vsyncpa [#allocation15], 0  ;;  %s1097_s21 = smov [#allocation5]   ;;  %s887_s25 = scalar_lea.hbm %s1371_s1, 128 }
   0x6   :  { %s40_s22 = sshll.u32 %s1097_s21, 4  ;;  %p888_p0 = scmp.ne.s32.totalorder %s1371_s1, %s887_s25  ;;  %s41_s22 = int_to_ptr.vmem [resolvable:$true] %s40_s22 }
   0x7   :  { %p891_p1 = scmp.lt.u32.totalorder %s887_s25, %s1371_s1 }
   0x9   :  { %p893_p2 = pnand %p891_p1, %p888_p0 }
   0xb   :  { %896 = shalt.err (!%p893_p2)
}
   0xc   :  { %s897_s30 = scalar_lea.vmem %s41_s22, 128  ;;  %p902_p4 = scmp.lt.s32.totalorder %s41_s22, %s41_s22 }
   0xd   :  { %p898_p3 = scmp.ne.s32.totalorder %s41_s22, %s897_s30  ;;  %p903_p5 = scmp.lt.s32.totalorder %s897_s30, %s897_s30 }
   0xf   :  { %p904_p6 = por %p903_p5, %p902_p4 }
  0x11   :  { %p905_p7 = pnand %p904_p6, %p898_p3 }
  0x13   :  { %908 = shalt.err (!%p905_p7)
}
  0x14   :  { %43 = dma.hbm_to_vmem [thread:$0]  %s1371_s1, 128, %s41_s22, [#allocation6]  }
  0x15   :  { %s1098_s15 = smov [#allocation8]   ;;  %s1099_s17 = smov [#allocation2]  }
  0x16   :  { %s63_s16 = sshll.u32 %s1098_s15, 4  ;;  %s30_s18 = sshll.u32 %s1099_s17, 4  ;;  %s64_s16 = int_to_ptr.vmem [resolvable:$true] %s63_s16  ;;  %s31_s18 = int_to_ptr.vmem [resolvable:$true] %s30_s18 }
  0x17   :  { %s909_s21 = scalar_lea.hbm %s1374_s4, 2048 }
  0x18   :  { %p910_p8 = scmp.ne.s32.totalorder %s1374_s4, %s909_s21  ;;  %p913_p9 = scmp.lt.u32.totalorder %s909_s21, %s1374_s4 }
  0x1a   :  { %p915_p10 = pnand %p913_p9, %p910_p8 }
  0x1c   :  { %918 = shalt.err (!%p915_p10)
}
  0x1d   :  { %s919_s1 = scalar_lea.vmem %s64_s16, 2048  ;;  %p924_p12 = scmp.lt.s32.totalorder %s64_s16, %s64_s16 }
  0x1e   :  { %p920_p11 = scmp.ne.s32.totalorder %s64_s16, %s919_s1  ;;  %p925_p13 = scmp.lt.s32.totalorder %s919_s1, %s919_s1 }
  0x20   :  { %p926_p0 = por %p925_p13, %p924_p12 }
  0x22   :  { %p927_p1 = pnand %p926_p0, %p920_p11 }
  0x24   :  { %930 = shalt.err (!%p927_p1)
}
  0x25   :  { %s1100_s22 = smov 128   ;;  %s1101_s27 = smov 8  }
  0x26   :  { %69 = dma.hbm_to_vmem [thread:$0]  %s1374_s4, 2048, %s64_s16, [#allocation9], %s1100_s22, %s1100_s22, %s1101_s27  }
  0x27   :  { %s931_s14 = scalar_lea.hbm %s1370_s0, 128 }
  0x28   :  { %p932_p2 = scmp.ne.s32.totalorder %s1370_s0, %s931_s14  ;;  %p935_p3 = scmp.lt.u32.totalorder %s931_s14, %s1370_s0 }
  0x2a   :  { %p937_p4 = pnand %p935_p3, %p932_p2 }
  0x2c   :  { %940 = shalt.err (!%p937_p4)
}
  0x2d   :  { %s941_s21 = scalar_lea.vmem %s31_s18, 128  ;;  %p946_p6 = scmp.lt.s32.totalorder %s31_s18, %s31_s18 }
  0x2e   :  { %p942_p5 = scmp.ne.s32.totalorder %s31_s18, %s941_s21  ;;  %p947_p7 = scmp.lt.s32.totalorder %s941_s21, %s941_s21 }
  0x30   :  { %p948_p8 = por %p947_p7, %p946_p6 }
  0x32   :  { %p949_p9 = pnand %p948_p8, %p942_p5 }
  0x34   :  { %952 = shalt.err (!%p949_p9)
}
  0x35   :  { %33 = dma.hbm_to_vmem [thread:$0]  %s1370_s0, 128, %s31_s18, [#allocation3]  }
  0x36   :  { %s1102_s23 = smov [#allocation7]   ;;  %s1103_s25 = smov [#allocation10]  }
  0x37   :  { %s49_s24 = sshll.u32 %s1102_s23, 4  ;;  %s77_s26 = sshll.u32 %s1103_s25, 4  ;;  %s50_s24 = int_to_ptr.vmem [resolvable:$true] %s49_s24  ;;  %s78_s26 = int_to_ptr.vmem [resolvable:$true] %s77_s26 }
  0x38   :  { %s953_s29 = scalar_lea.hbm %s1372_s2, 2048 }
  0x39   :  { %p954_p10 = scmp.ne.s32.totalorder %s1372_s2, %s953_s29  ;;  %p957_p11 = scmp.lt.u32.totalorder %s953_s29, %s1372_s2 }
  0x3b   :  { %p959_p12 = pnand %p957_p11, %p954_p10 }
  0x3d   :  { %962 = shalt.err (!%p959_p12)
}
  0x3e   :  { %s963_s0 = scalar_lea.vmem %s50_s24, 2048  ;;  %p968_p0 = scmp.lt.s32.totalorder %s50_s24, %s50_s24 }
  0x3f   :  { %p964_p13 = scmp.ne.s32.totalorder %s50_s24, %s963_s0  ;;  %p969_p1 = scmp.lt.s32.totalorder %s963_s0, %s963_s0 }
  0x41   :  { %p970_p2 = por %p969_p1, %p968_p0 }
  0x43   :  { %p971_p3 = pnand %p970_p2, %p964_p13 }
  0x45   :  { %974 = shalt.err (!%p971_p3)
}
  0x46   :  { %55 = dma.hbm_to_vmem [thread:$0]  %s1372_s2, 2048, %s50_s24, [#allocation6], %s1100_s22, %s1100_s22, %s1101_s27  }
  0x47   :  { %s975_s21 = scalar_lea.hbm %s1376_s6, 2048 }
  0x48   :  { %p976_p4 = scmp.ne.s32.totalorder %s1376_s6, %s975_s21  ;;  %p979_p5 = scmp.lt.u32.totalorder %s975_s21, %s1376_s6 }
  0x4a   :  { %p981_p6 = pnand %p979_p5, %p976_p4 }
  0x4c   :  { %984 = shalt.err (!%p981_p6)
}
  0x4d   :  { %s985_s1 = scalar_lea.vmem %s78_s26, 2048  ;;  %p990_p8 = scmp.lt.s32.totalorder %s78_s26, %s78_s26 }
  0x4e   :  { %p986_p7 = scmp.ne.s32.totalorder %s78_s26, %s985_s1  ;;  %p991_p9 = scmp.lt.s32.totalorder %s985_s1, %s985_s1 }
  0x50   :  { %p992_p10 = por %p991_p9, %p990_p8 }
  0x52   :  { %p993_p11 = pnand %p992_p10, %p986_p7 }
  0x54   :  { %996 = shalt.err (!%p993_p11)
}
  0x55   :  { %83 = dma.hbm_to_vmem [thread:$0]  %s1376_s6, 2048, %s78_s26, [#allocation9], %s1100_s22, %s1100_s22, %s1101_s27  }
  0x56   :  { %s1104_s28 = smov [#allocation11]   ;;  %s997_s14 = scalar_lea.hbm %s1378_s8, 2048 }
  0x57   :  { %s91_s29 = sshll.u32 %s1104_s28, 4  ;;  %p998_p12 = scmp.ne.s32.totalorder %s1378_s8, %s997_s14  ;;  %s92_s29 = int_to_ptr.vmem [resolvable:$true] %s91_s29 }
  0x58   :  { %p1001_p13 = scmp.lt.u32.totalorder %s997_s14, %s1378_s8 }
  0x5a   :  { %p1003_p0 = pnand %p1001_p13, %p998_p12 }
  0x5c   :  { %1006 = shalt.err (!%p1003_p0)
}
  0x5d   :  { %s1007_s19 = scalar_lea.vmem %s92_s29, 2048  ;;  %p1012_p2 = scmp.lt.s32.totalorder %s92_s29, %s92_s29 }
  0x5e   :  { %p1008_p1 = scmp.ne.s32.totalorder %s92_s29, %s1007_s19  ;;  %p1013_p3 = scmp.lt.s32.totalorder %s1007_s19, %s1007_s19 }
  0x60   :  { %p1014_p4 = por %p1013_p3, %p1012_p2 }
  0x62   :  { %p1015_p5 = pnand %p1014_p4, %p1008_p1 }
  0x64   :  { %1018 = shalt.err (!%p1015_p5)
}
  0x65   :  { %97 = dma.hbm_to_vmem [thread:$0]  %s1378_s8, 2048, %s92_s29, [#allocation12], %s1100_s22, %s1100_s22, %s1101_s27  }
  0x66   :  { %1085 = dma.done.wait [#allocation3], 128  }
  0x67   :  { %1086 = vsyncadd [#allocation3], 4294967168 }
  0x68   :  { %1087 = dma.done.wait [#allocation6], 2176  }
  0x69   :  { %1088 = vsyncadd [#allocation6], 4294965120 }
  0x6a   :  { %1089 = dma.done.wait [#allocation9], 4096  }
  0x6b   :  { %1090 = vsyncadd [#allocation9], 4294963200 }
  0x6c   :  { %1091 = dma.done.wait [#allocation12], 2048  }
  0x6d   :  { %1092 = vsyncadd [#allocation12], 4294965248  ;;  %v1105_v0 = vmov 0.0|0.0   ;;  %vm1106_vm0 = vmmov 0   ;;  %v1107_v1 = vmov 0.0   ;;  %v120_v2 = vld [vmem:[#allocation7] sm:$0xff] }
  0x6e   :  { %769 = vmatprep.subr.bf16.mxu0 %v1105_v0  ;;  %793 = vmatprep.subr.bf16.mxu1 %v1105_v0  ;;  %v121_v3 = vld [vmem:[#allocation7 + $0x8] sm:$0xff]  ;;  %v219_v4 = vld [vmem:[#allocation8] sm:$0xff]  ;;  %v122_v7 = vld [vmem:[#allocation7 + $0x10] sm:$0xff]  ;;  %s1108_s21 = smov [#allocation13]   ;;  %s1109_s25 = smov [#allocation14]  }
  0x6f   :  { %661 = vmatprep.mubr.msk.f32.mxu0 %vm1106_vm0, %v1107_v1  ;;  %696 = vmatprep.mubr.msk.f32.mxu1 %vm1106_vm0, %v1107_v1  ;;  %v770_v5 = vpack.c.bf16 %v121_v3, %v120_v2  ;;  %v220_v6 = vld [vmem:[#allocation8 + $0x8] sm:$0xff]  ;;  %v123_v8 = vld [vmem:[#allocation7 + $0x18] sm:$0xff]  ;;  %v221_v10 = vld [vmem:[#allocation8 + $0x10] sm:$0xff]  ;;  %s516_s4 = sshll.u32 %s1108_s21, 4  ;;  %s526_s1 = sshll.u32 %s1109_s25, 4  ;;  %s517_s4 = int_to_ptr.vmem [resolvable:$true] %s516_s4  ;;  %s1320_s1 = int_to_ptr.vmem [resolvable:$true] %s526_s1 }
  0x70   :  { %v794_v9 = vpack.c.bf16 %v220_v6, %v219_v4  ;;  %v222_v11 = vld [vmem:[#allocation8 + $0x18] sm:$0xff]  ;;  %v773_v12 = vpack.c.bf16 %v123_v8, %v122_v7  ;;  %v124_v14 = vld [vmem:[#allocation7 + $0x20] sm:$0xff]  ;;  %v125_v15 = vld [vmem:[#allocation7 + $0x28] sm:$0xff]  ;;  %s1110_s2 = smov [#allocation16]   ;;  %p1024_p7 = scmp.lt.s32.totalorder %s517_s4, %s517_s4 }
  0x71   :  { %771 = vmatpush3.bf16.msra.mxu0 %v770_v5  ;;  %v797_v13 = vpack.c.bf16 %v222_v11, %v221_v10  ;;  %v223_v16 = vld [vmem:[#allocation8 + $0x20] sm:$0xff]  ;;  %v224_v17 = vld [vmem:[#allocation8 + $0x28] sm:$0xff]  ;;  %v776_v18 = vpack.c.bf16 %v125_v15, %v124_v14  ;;  %v126_v20 = vld [vmem:[#allocation7 + $0x30] sm:$0xff]  ;;  %s536_s24 = sshll.u32 %s1110_s2, 4  ;;  %s1322_s24 = int_to_ptr.vmem [resolvable:$true] %s536_s24 }
  0x72   :  { %795 = vmatpush3.bf16.msra.mxu1 %v794_v9  ;;  %772 = vmatprep.subr.bf16.mxu0 %v1105_v0  ;;  %v800_v19 = vpack.c.bf16 %v224_v17, %v223_v16  ;;  %v127_v21 = vld [vmem:[#allocation7 + $0x38] sm:$0xff]  ;;  %v225_v22 = vld [vmem:[#allocation8 + $0x30] sm:$0xff]  ;;  %v128_v26 = vld [vmem:[#allocation7 + $0x40] sm:$0xff] }
  0x73   :  { %796 = vmatprep.subr.bf16.mxu1 %v1105_v0  ;;  %v226_v23 = vld [vmem:[#allocation8 + $0x38] sm:$0xff]  ;;  %v779_v24 = vpack.c.bf16 %v127_v21, %v126_v20  ;;  %v129_v27 = vld [vmem:[#allocation7 + $0x48] sm:$0xff]  ;;  %v227_v28 = vld [vmem:[#allocation8 + $0x40] sm:$0xff] }
  0x74   :  { %v803_v25 = vpack.c.bf16 %v226_v23, %v225_v22  ;;  %v228_v29 = vld [vmem:[#allocation8 + $0x48] sm:$0xff]  ;;  %v782_v30 = vpack.c.bf16 %v129_v27, %v128_v26  ;;  %v130_v32 = vld [vmem:[#allocation7 + $0x50] sm:$0xff]  ;;  %v131_v33 = vld [vmem:[#allocation7 + $0x58] sm:$0xff] }
  0x75   :  { %774 = vmatpush3.bf16.msra.mxu0 %v773_v12  ;;  %v806_v31 = vpack.c.bf16 %v228_v29, %v227_v28  ;;  %v229_v34 = vld [vmem:[#allocation8 + $0x50] sm:$0xff]  ;;  %v230_v35 = vld [vmem:[#allocation8 + $0x58] sm:$0xff]  ;;  %v785_v36 = vpack.c.bf16 %v131_v33, %v130_v32  ;;  %v132_v38 = vld [vmem:[#allocation7 + $0x60] sm:$0xff] }
  0x76   :  { %798 = vmatpush3.bf16.msra.mxu1 %v797_v13  ;;  %775 = vmatprep.subr.bf16.mxu0 %v1105_v0  ;;  %v809_v37 = vpack.c.bf16 %v230_v35, %v229_v34  ;;  %v133_v39 = vld [vmem:[#allocation7 + $0x68] sm:$0xff]  ;;  %v231_v40 = vld [vmem:[#allocation8 + $0x60] sm:$0xff]  ;;  %v134_v44 = vld [vmem:[#allocation7 + $0x70] sm:$0xff] }
  0x77   :  { %799 = vmatprep.subr.bf16.mxu1 %v1105_v0  ;;  %v232_v41 = vld [vmem:[#allocation8 + $0x68] sm:$0xff]  ;;  %v788_v42 = vpack.c.bf16 %v133_v39, %v132_v38  ;;  %v135_v45 = vld [vmem:[#allocation7 + $0x78] sm:$0xff]  ;;  %v233_v46 = vld [vmem:[#allocation8 + $0x70] sm:$0xff] }
  0x78   :  { %v812_v43 = vpack.c.bf16 %v232_v41, %v231_v40  ;;  %v234_v47 = vld [vmem:[#allocation8 + $0x78] sm:$0xff]  ;;  %v791_v48 = vpack.c.bf16 %v135_v45, %v134_v44  ;;  %v1280_v50 = vld [vmem:[#allocation2] sm:$0xff]  ;;  %v320_v52 = vld [vmem:[#allocation10] sm:$0xff] }
  0x79   :  { %777 = vmatpush3.bf16.msra.mxu0 %v776_v18  ;;  %v815_v49 = vpack.c.bf16 %v234_v47, %v233_v46  ;;  %v1282_v51 = vld [vmem:[#allocation5] sm:$0xff]  ;;  %v321_v53 = vld [vmem:[#allocation10 + $0x8] sm:$0xff]  ;;  %v413_v54 = vld [vmem:[#allocation11] sm:$0xff] }
  0x7a   :  { %801 = vmatpush3.bf16.msra.mxu1 %v800_v19  ;;  %778 = vmatprep.subr.bf16.mxu0 %v1105_v0  ;;  %v818_v55 = vpack.c.bf16 %v321_v53, %v320_v52  ;;  %v414_v56 = vld [vmem:[#allocation11 + $0x8] sm:$0xff]  ;;  %v322_v58 = vld [vmem:[#allocation10 + $0x10] sm:$0xff]  ;;  %v323_v59 = vld [vmem:[#allocation10 + $0x18] sm:$0xff] }
  0x7b   :  { %802 = vmatprep.subr.bf16.mxu1 %v1105_v0  ;;  %v842_v57 = vpack.c.bf16 %v414_v56, %v413_v54  ;;  %v415_v60 = vld [vmem:[#allocation11 + $0x10] sm:$0xff]  ;;  %v821_v61 = vpack.c.bf16 %v323_v59, %v322_v58  ;;  %v416_v62 = vld [vmem:[#allocation11 + $0x18] sm:$0xff]  ;;  %v325_v2 = vld [vmem:[#allocation10 + $0x28] sm:$0xff] }
  0x7c   :  { %v845_v63 = vpack.c.bf16 %v416_v62, %v415_v60  ;;  %v417_v3 = vld [vmem:[#allocation11 + $0x20] sm:$0xff]  ;;  %v418_v5 = vld [vmem:[#allocation11 + $0x28] sm:$0xff]  ;;  %v326_v7 = vld [vmem:[#allocation10 + $0x30] sm:$0xff] }
  0x7d   :  { %780 = vmatpush3.bf16.msra.mxu0 %v779_v24  ;;  %v848_v6 = vpack.c.bf16 %v418_v5, %v417_v3  ;;  %v327_v8 = vld [vmem:[#allocation10 + $0x38] sm:$0xff]  ;;  %v419_v9 = vld [vmem:[#allocation11 + $0x30] sm:$0xff]  ;;  %v328_v13 = vld [vmem:[#allocation10 + $0x40] sm:$0xff] }
  0x7e   :  { %804 = vmatpush3.bf16.msra.mxu1 %v803_v25  ;;  %781 = vmatprep.subr.bf16.mxu0 %v1105_v0  ;;  %v827_v10 = vpack.c.bf16 %v327_v8, %v326_v7  ;;  %v420_v11 = vld [vmem:[#allocation11 + $0x38] sm:$0xff]  ;;  %v329_v14 = vld [vmem:[#allocation10 + $0x48] sm:$0xff]  ;;  %v421_v15 = vld [vmem:[#allocation11 + $0x40] sm:$0xff] }
  0x7f   :  { %805 = vmatprep.subr.bf16.mxu1 %v1105_v0  ;;  %v851_v12 = vpack.c.bf16 %v420_v11, %v419_v9  ;;  %v830_v16 = vpack.c.bf16 %v329_v14, %v328_v13  ;;  %v422_v17 = vld [vmem:[#allocation11 + $0x48] sm:$0xff]  ;;  %v330_v19 = vld [vmem:[#allocation10 + $0x50] sm:$0xff]  ;;  %v331_v20 = vld [vmem:[#allocation10 + $0x58] sm:$0xff] }
  0x80   :  { %v854_v18 = vpack.c.bf16 %v422_v17, %v421_v15  ;;  %v423_v21 = vld [vmem:[#allocation11 + $0x50] sm:$0xff]  ;;  %v833_v22 = vpack.c.bf16 %v331_v20, %v330_v19  ;;  %v424_v23 = vld [vmem:[#allocation11 + $0x58] sm:$0xff]  ;;  %v332_v24 = vld [vmem:[#allocation10 + $0x60] sm:$0xff] }
  0x81   :  { %783 = vmatpush3.bf16.msra.mxu0 %v782_v30  ;;  %v333_v25 = vld [vmem:[#allocation10 + $0x68] sm:$0xff]  ;;  %v857_v26 = vpack.c.bf16 %v424_v23, %v423_v21  ;;  %v425_v27 = vld [vmem:[#allocation11 + $0x60] sm:$0xff]  ;;  %v335_v32 = vld [vmem:[#allocation10 + $0x78] sm:$0xff] }
  0x82   :  { %807 = vmatpush3.bf16.msra.mxu1 %v806_v31  ;;  %784 = vmatprep.subr.bf16.mxu0 %v1105_v0  ;;  %v426_v28 = vld [vmem:[#allocation11 + $0x68] sm:$0xff]  ;;  %v836_v29 = vpack.c.bf16 %v333_v25, %v332_v24  ;;  %v334_v31 = vld [vmem:[#allocation10 + $0x70] sm:$0xff]  ;;  %v428_v34 = vld [vmem:[#allocation11 + $0x78] sm:$0xff] }
  0x83   :  { %808 = vmatprep.subr.bf16.mxu1 %v1105_v0  ;;  %v860_v30 = vpack.c.bf16 %v426_v28, %v425_v27  ;;  %v427_v33 = vld [vmem:[#allocation11 + $0x70] sm:$0xff]  ;;  %v839_v35 = vpack.c.bf16 %v335_v32, %v334_v31 }
  0x84   :  { %v557_v38 = vld [vmem:[%s1375_s5] ss:$0 sm:$0xff] }
  0x85   :  { %786 = vmatpush3.bf16.msra.mxu0 %v785_v36  ;;  %v863_v36 = vpack.c.bf16 %v428_v34, %v427_v33  ;;  %v559_v56 = vld [vmem:[%s1377_s7] ss:$0 sm:$0xff]  ;;  %s1019_s7 = scalar_lea.vmem %s517_s4, 128 }
  0x86   :  { %810 = vmatpush3.bf16.msra.mxu1 %v809_v37  ;;  %787 = vmatprep.subr.bf16.mxu0 %v1105_v0  ;;  %v555_v37 = vld [vmem:[%s1373_s3] ss:$0 sm:$0xff]  ;;  %p1020_p6 = scmp.ne.s32.totalorder %s517_s4, %s1019_s7  ;;  %p1025_p8 = scmp.lt.s32.totalorder %s1019_s7, %s1019_s7 }
  0x87   :  { %811 = vmatprep.subr.bf16.mxu1 %v1105_v0 }
  0x88   :  { %p1026_p9 = por %p1025_p8, %p1024_p7 }
  0x89   :  { %789 = vmatpush3.bf16.msra.mxu0 %v788_v42 }
  0x8a   :  { %813 = vmatpush3.bf16.msra.mxu1 %v812_v43  ;;  %790 = vmatprep.subr.bf16.mxu0 %v1105_v0  ;;  %p1027_p10 = pnand %p1026_p9, %p1020_p6 }
  0x8b   :  { %814 = vmatprep.subr.bf16.mxu1 %v1105_v0 }
  0x8d   :  { %792 = vmatpush3.bf16.msra.mxu0 %v791_v48 }
  0x8e   :  { %816 = vmatpush3.bf16.msra.mxu1 %v815_v49  ;;  %817 = vmatprep.subr.bf16.mxu0 %v1105_v0 }
  0x8f   :  { %841 = vmatprep.subr.bf16.mxu1 %v1105_v0 }
  0x90   :  { %662 = vmatmul.mubr.f32.vlgmr.msra.gmra.mrb[0].mxu0 %v1280_v50 }
  0x91   :  { %697 = vmatmul.mubr.f32.vlgmr.msra.gmra.mrb[0].mxu1 %v1282_v51  ;;  %731 = vmatprep.mubr.msk.f32.mxu0 %vm1106_vm0, %v1107_v1 }
  0x92   :  { %766 = vmatprep.mubr.msk.f32.mxu1 %vm1106_vm0, %v1107_v1  ;;  %819 = vmatpush3.bf16.msra.mxu0 %v818_v55  ;;  %v324_v1 = vld [vmem:[#allocation10 + $0x20] sm:$0xff] }
  0x93   :  { %843 = vmatpush3.bf16.msra.mxu1 %v842_v57  ;;  %820 = vmatprep.subr.bf16.mxu0 %v1105_v0  ;;  %v824_v4 = vpack.c.bf16 %v325_v2, %v324_v1  ;;  %v560_v57 = vld [vmem:[%s1379_s9] ss:$0 sm:$0xff] }
  0x94   :  { %844 = vmatprep.subr.bf16.mxu1 %v1105_v0 }
  0x96   :  { %822 = vmatpush3.bf16.msra.mxu0 %v821_v61 }
  0x97   :  { %846 = vmatpush3.bf16.msra.mxu1 %v845_v63  ;;  %823 = vmatprep.subr.bf16.mxu0 %v1105_v0 }
  0x98   :  { %847 = vmatprep.subr.bf16.mxu1 %v1105_v0 }
  0x9a   :  { %825 = vmatpush3.bf16.msra.mxu0 %v824_v4 }
  0x9b   :  { %849 = vmatpush3.bf16.msra.mxu1 %v848_v6  ;;  %826 = vmatprep.subr.bf16.mxu0 %v1105_v0 }
  0x9c   :  { %850 = vmatprep.subr.bf16.mxu1 %v1105_v0 }
  0x9e   :  { %828 = vmatpush3.bf16.msra.mxu0 %v827_v10 }
  0x9f   :  { %852 = vmatpush3.bf16.msra.mxu1 %v851_v12  ;;  %829 = vmatprep.subr.bf16.mxu0 %v1105_v0 }
  0xa0   :  { %853 = vmatprep.subr.bf16.mxu1 %v1105_v0 }
  0xa2   :  { %831 = vmatpush3.bf16.msra.mxu0 %v830_v16 }
  0xa3   :  { %855 = vmatpush3.bf16.msra.mxu1 %v854_v18  ;;  %832 = vmatprep.subr.bf16.mxu0 %v1105_v0 }
  0xa4   :  { %856 = vmatprep.subr.bf16.mxu1 %v1105_v0 }
  0xa6   :  { %834 = vmatpush3.bf16.msra.mxu0 %v833_v22 }
  0xa7   :  { %858 = vmatpush3.bf16.msra.mxu1 %v857_v26  ;;  %835 = vmatprep.subr.bf16.mxu0 %v1105_v0 }
  0xa8   :  { %859 = vmatprep.subr.bf16.mxu1 %v1105_v0 }
  0xaa   :  { %837 = vmatpush3.bf16.msra.mxu0 %v836_v29 }
  0xab   :  { %861 = vmatpush3.bf16.msra.mxu1 %v860_v30  ;;  %838 = vmatprep.subr.bf16.mxu0 %v1105_v0 }
  0xac   :  { %862 = vmatprep.subr.bf16.mxu1 %v1105_v0 }
  0xae   :  { %840 = vmatpush3.bf16.msra.mxu0 %v839_v35 }
  0xaf   :  { %864 = vmatpush3.bf16.msra.mxu1 %v863_v36 }
 0x163   :  { %v209_v39 = vpop.f32.mrb[0].mxu0 }
 0x164   :  { %v210_v40 = vadd.f32 %v555_v37, %v209_v39  ;;  %v308_v41 = vpop.f32.mrb[0].mxu1  ;;  %v663_v42 = vpop.f32.mrb[1].mxu0 }
 0x165   :  { %v309_v43 = vadd.f32 %v557_v38, %v308_v41  ;;  %v698_v44 = vpop.f32.mrb[1].mxu1 }
 0x166   :  { %v556_v45 = vmul.f32 -1.442695, %v210_v40 }
 0x167   :  { %v558_v46 = vmul.f32 -1.442695, %v309_v43 }
 0x168   :  { %879 = vpow2.f32 %v556_v45 }
 0x169   :  { %881 = vpow2.f32 %v558_v46 }
 0x172   :  { %v880_v0 = vpop.eup %879 }
 0x173   :  { %v882_v47 = vpop.eup %881  ;;  %v216_v48 = vadd.f32 1.0, %v880_v0 }
 0x174   :  { %v315_v49 = vadd.f32 1.0, %v882_v47 }
 0x175   :  { %883 = vrcp.f32 %v216_v48 }
 0x176   :  { %885 = vrcp.f32 %v315_v49 }
 0x17f   :  { %v884_v52 = vpop.eup %883 }
 0x180   :  { %v886_v53 = vpop.eup %885  ;;  %v318_v54 = vmul.f32 %v884_v52, %v1280_v50 }
 0x181   :  { %v319_v55 = vmul.f32 %v886_v53, %v1282_v51 }
 0x182   :  { %732 = vmatmul.mubr.f32.vlgmr.msra.gmra.mrb[2].mxu0 %v318_v54 }
 0x183   :  { %767 = vmatmul.mubr.f32.vlgmr.msra.gmra.mrb[2].mxu1 %v319_v55 }
 0x255   :  { %v409_v58 = vpop.f32.mrb[2].mxu0 }
 0x256   :  { %v410_v50 = vadd.f32 %v559_v56, %v409_v58  ;;  %v502_v59 = vpop.f32.mrb[2].mxu1  ;;  %v733_v51 = vpop.f32.mrb[3].mxu0 }
 0x257   :  { %v503_v60 = vadd.f32 %v560_v57, %v502_v59  ;;  %v768_v61 = vpop.f32.mrb[3].mxu1 }
 0x258   :  { %506 = vst [vmem:[#allocation13] sm:$0xff] %v410_v50 }
 0x259   :  { %v508_v62 = vadd.f32 %v503_v60, %v410_v50  ;;  %507 = vst [vmem:[#allocation14] sm:$0xff] %v503_v60 }
 0x25a   :  { %1030 = shalt.err (!%p1027_p10)
}
 0x25b   :  { %s1031_s29 = scalar_lea.hbm %s1380_s10, 128 }
 0x25c   :  { %p1032_p11 = scmp.ne.s32.totalorder %s1380_s10, %s1031_s29  ;;  %p1035_p12 = scmp.lt.u32.totalorder %s1031_s29, %s1380_s10 }
 0x25e   :  { %p1037_p13 = pnand %p1035_p12, %p1032_p11 }
 0x260   :  { %1040 = shalt.err (!%p1037_p13)
}
 0x261   :  { %519 = dma.vmem_to_hbm [thread:$0]  %s517_s4, 128, %s1380_s10, [#allocation4]  }
 0x262   :  { %s1041_s17 = scalar_lea.vmem %s1320_s1, 128  ;;  %p1046_p1 = scmp.lt.s32.totalorder %s1320_s1, %s1320_s1 }
 0x263   :  { %p1042_p0 = scmp.ne.s32.totalorder %s1320_s1, %s1041_s17  ;;  %p1047_p2 = scmp.lt.s32.totalorder %s1041_s17, %s1041_s17 }
 0x265   :  { %p1048_p3 = por %p1047_p2, %p1046_p1 }
 0x267   :  { %p1049_p4 = pnand %p1048_p3, %p1042_p0 }
 0x269   :  { %1052 = shalt.err (!%p1049_p4)
}
 0x26a   :  { %s1053_s26 = scalar_lea.hbm %s1381_s11, 128 }
 0x26b   :  { %p1054_p5 = scmp.ne.s32.totalorder %s1381_s11, %s1053_s26  ;;  %p1057_p6 = scmp.lt.u32.totalorder %s1053_s26, %s1381_s11 }
 0x26d   :  { %p1059_p7 = pnand %p1057_p6, %p1054_p5 }
 0x26f   :  { %1062 = shalt.err (!%p1059_p7)
}
 0x270   :  { %529 = dma.vmem_to_hbm [thread:$0]  %s1320_s1, 128, %s1381_s11, [#allocation15]   ;;  %509 = vst [vmem:[#allocation16] sm:$0xff] %v508_v62 }
 0x271   :  { %s1063_s5 = scalar_lea.vmem %s1322_s24, 128  ;;  %p1068_p9 = scmp.lt.s32.totalorder %s1322_s24, %s1322_s24 }
 0x272   :  { %p1064_p8 = scmp.ne.s32.totalorder %s1322_s24, %s1063_s5  ;;  %p1069_p10 = scmp.lt.s32.totalorder %s1063_s5, %s1063_s5 }
 0x274   :  { %p1070_p11 = por %p1069_p10, %p1068_p9 }
 0x276   :  { %p1071_p12 = pnand %p1070_p11, %p1064_p8 }
 0x278   :  { %1074 = shalt.err (!%p1071_p12)
}
 0x279   :  { %s1075_s16 = scalar_lea.hbm %s1382_s12, 128 }
 0x27a   :  { %p1076_p13 = scmp.ne.s32.totalorder %s1382_s12, %s1075_s16  ;;  %p1079_p0 = scmp.lt.u32.totalorder %s1075_s16, %s1382_s12 }
 0x27c   :  { %p1081_p1 = pnand %p1079_p0, %p1076_p13 }
 0x27e   :  { %1084 = shalt.err (!%p1081_p1)
}
 0x27f   :  { %539 = dma.vmem_to_hbm [thread:$0]  %s1322_s24, 128, %s1382_s12, [#allocation15]  }
 0x280   :  { %1093 = dma.done.wait [#allocation4], 128  }
 0x281   :  { %1094 = vsyncadd [#allocation4], 4294967168 }
 0x282   :  { %1095 = dma.done.wait [#allocation15], 256  }
 0x283   :  { %1096 = vsyncadd [#allocation15], 4294967040 }
 0x284   :  { %549 = vsyncpa [#allocation3], 1 }
 0x285   :  { %550 = vsyncpa [#allocation6], 1 }
 0x286   :  { %551 = vsyncpa [#allocation9], 1 }
 0x287   :  { %552 = vsyncpa [#allocation12], 1 }
 0x288   :  { %553 = vsyncpa [#allocation4], 1 }
 0x289   :  { %554 = vsyncpa [#allocation15], 1 }

</bundles_post_ra>
